<compile_context>
chip_gen: v7x
topology: tpu7x:2x2x1
jax: 0.10.0
libtpu: 0.0.40
codegen_flags: <defaults>
</compile_context>

<pallas_src>
import functools

import jax
import jax.numpy as jnp
from jax import lax
from jax.experimental import pallas as pl
from jax.experimental.pallas import tpu as pltpu


def _mtad_kernel(x_flat_ref, type_ref, w1_top_ref, w1_bot_ref, w2_ref,
                 adj_ref, out_ref, *, node_index):
    f32 = jnp.float32
    BN, I = x_flat_ref.shape          # (batch_tile * node_num, num_inputs)
    TB, NN, _ = out_ref.shape         # (batch_tile, node_num, 1)
    TF, T = w2_ref.shape              # (type_num * 16, type_num)

    xv = x_flat_ref[...]                                              # [BN, I]
    x3 = xv.reshape(TB, NN, I)        # layout-preserving (NN % 8 == 0)

    # Target-node rows via masked sublane reduction (no extra input / DMA).
    n_iota = lax.broadcasted_iota(jnp.int32, (1, NN, 1), 1)
    node_sel = (n_iota == node_index).astype(f32)                     # [1, NN, 1]
    x_tgt = jnp.sum(x3 * node_sel, axis=1)                            # [TB, I]

    # Layer 1: concat([x_tgt, x]) @ a1[t] for all types at once (2D matmuls),
    # then a sublane broadcast-add of the per-batch target contribution.
    top = jnp.dot(x_tgt, w1_top_ref[...], preferred_element_type=f32)  # [TB, TF]
    bot = jnp.dot(xv, w1_bot_ref[...], preferred_element_type=f32)     # [BN, TF]
    h_pre = bot.reshape(TB, NN, TF) + top[:, None, :]                  # [TB, NN, TF]
    h = jnp.maximum(h_pre, 0.01 * h_pre)                               # LeakyReLU

    # Layer 2: block-diagonal a2 -> per-type scalar score in one matmul.
    e_pre = jnp.dot(h.reshape(BN, TF), w2_ref[...],
                    preferred_element_type=f32)                        # [BN, T]
    e_all = jnp.maximum(e_pre, 0.01 * e_pre)                           # LeakyReLU

    # Per-batch type selection (exact for a strict one-hot; mask/softmax
    # commute with the selection since they are applied identically per type).
    t_iota = lax.broadcasted_iota(jnp.int32, (TB, T), 1)
    onehot = (t_iota == type_ref[...]).astype(f32)                     # [TB, T]
    e_sel = jnp.sum(e_all.reshape(TB, NN, T) * onehot[:, None, :],
                    axis=-1, keepdims=True)                            # [TB, NN, 1]

    # Masked, numerically-stable softmax over the node axis, then re-mask.
    adj = adj_ref[...]                                                 # [1, NN, 1]
    masked = jnp.where(adj > 0, e_sel, jnp.full_like(e_sel, -9e15))
    m = jnp.max(masked, axis=1, keepdims=True)                         # [TB, 1, 1]
    p = jnp.exp(masked - m)
    s = jnp.sum(p, axis=1, keepdims=True)                              # [TB, 1, 1]
    inv = pl.reciprocal(s, approx=True)
    inv = inv * (2.0 - s * inv)        # one Newton step -> full f32 accuracy
    out_ref[...] = p * inv * adj                                       # [TB, NN, 1]


def prepare_params(a1, a2):
    """One-time re-layout of module parameters (hoisted out of the hot path).

    a1: [T, 2I, F] -> w1_top [I, T*F] (rows hitting x_tgt),
                      w1_bot [I, T*F] (rows hitting x)
    a2: [T, F, 1]  -> w2_block [T*F, T] block-diagonal.
    """
    T, two_i, F = a1.shape
    I = two_i // 2
    w1 = jnp.transpose(a1, (1, 0, 2)).reshape(two_i, T * F)
    w1_top = w1[:I]
    w1_bot = w1[I:]
    w2_block = (a2.reshape(T, F, 1) *
                jnp.eye(T, dtype=a2.dtype)[:, None, :]).reshape(T * F, T)
    return w1_top, w1_bot, w2_block


@functools.partial(jax.jit, static_argnames=("node_index",))
def multi_type_attention_forward(x, adj_mask, type_index,
                                 w1_top, w1_bot, w2_block, *, node_index):
    """Returns the Categorical `probs` tensor of the module's forward.

    x:          [B, NN, I] float32
    adj_mask:   [NN]       float32 (0/1 neighbor mask)
    type_index: [B]        int32
    """
    B, NN, I = x.shape
    TF, T = w2_block.shape
    x_flat = x.reshape(B * NN, I)                # free reshape
    adj3 = adj_mask.astype(jnp.float32).reshape(1, NN, 1)
    type2 = type_index.astype(jnp.int32).reshape(B, 1)

    # Batch tile: single block at toy sizes; at large B, tile (multiple of 8)
    # so the grid shards across TensorCores and bounds live intermediates.
    if B > 128 and B % 128 == 0:
        TB = 128
    else:
        TB = B
    grid = (B // TB,)

    kernel = functools.partial(_mtad_kernel, node_index=node_index)
    out = pl.pallas_call(
        kernel,
        out_shape=jax.ShapeDtypeStruct((B, NN, 1), jnp.float32),
        grid=grid,
        in_specs=[
            pl.BlockSpec((TB * NN, I), lambda b: (b, 0)),       # x_flat
            pl.BlockSpec((TB, 1), lambda b: (b, 0)),            # type indices
            pl.BlockSpec((I, TF), lambda b: (0, 0)),            # w1_top
            pl.BlockSpec((I, TF), lambda b: (0, 0)),            # w1_bot
            pl.BlockSpec((TF, T), lambda b: (0, 0)),            # w2_block
            pl.BlockSpec((1, NN, 1), lambda b: (0, 0, 0)),      # adj mask
        ],
        out_specs=pl.BlockSpec((TB, NN, 1), lambda b: (b, 0, 0)),
        compiler_params=pltpu.CompilerParams(
            dimension_semantics=("parallel",)),
    )(x_flat, type2, w1_top, w1_bot, w2_block, adj3)
    return out.reshape(B, NN)


def init_params(key, num_inputs, type_num, gain=1.414):
    """xavier_uniform(gain=1.414) for a1 [T, 2I, 16] and a2 [T, 16, 1]."""
    F = 16
    k1, k2 = jax.random.split(key)

    def xavier(k, shape):
        receptive = 1
        for d in shape[2:]:
            receptive *= d
        fan_in = shape[1] * receptive
        fan_out = shape[0] * receptive
        bound = gain * (6.0 / (fan_in + fan_out)) ** 0.5
        return jax.random.uniform(k, shape, jnp.float32, -bound, bound)

    a1 = xavier(k1, (type_num, 2 * num_inputs, F))
    a2 = xavier(k2, (type_num, F, 1))
    return a1, a2


def reference_forward(x, node_index, adj_mask, type_index, a1, a2):
    """Pure-JAX transcription of the PyTorch forward (returns the probs)."""
    B, NN, I = x.shape
    T = a1.shape[0]
    onehot = jax.nn.one_hot(type_index, T, dtype=x.dtype)             # [B, T]
    x_tgt = x[:, node_index, :]                                       # [B, I]
    concat = jnp.concatenate(
        [jnp.broadcast_to(x_tgt[:, None, :], (B, NN, I)), x], axis=-1)
    atts = []
    for t in range(T):
        e = jax.nn.leaky_relu(jnp.matmul(concat, a1[t], precision="highest"))
        e = jax.nn.leaky_relu(
            jnp.matmul(e, a2[t], precision="highest")[..., 0])        # [B, NN]
        masked = jnp.where(adj_mask > 0, e, -9e15)
        att = jax.nn.softmax(masked, axis=1) * adj_mask[None, :]
        atts.append(att)
    concat_x = jnp.stack(atts, axis=-2)                               # [B, T, NN]
    return jnp.sum(concat_x * onehot[..., None], axis=-2)             # [B, NN]


# TODO(synk): the module wraps `result` in torch.distributions.Categorical;
# this script returns the probs tensor that parameterizes it.

if __name__ == "__main__":
    B, node_num, num_inputs, type_num = 4, 16, 8, 3
    node_index = 5

    key = jax.random.PRNGKey(0)
    k_par, k_x, k_adj, k_type = jax.random.split(key, 4)

    a1, a2 = init_params(k_par, num_inputs, type_num)
    x = jax.random.normal(k_x, (B, node_num, num_inputs), jnp.float32)
    adj_mask = (jax.random.uniform(k_adj, (node_num,)) > 0.4).astype(jnp.float32)
    adj_mask = adj_mask.at[node_index].set(1.0)
    type_index = jax.random.randint(k_type, (B,), 0, type_num)

    w1_top, w1_bot, w2_block = prepare_params(a1, a2)

    probs = multi_type_attention_forward(
        x, adj_mask, type_index, w1_top, w1_bot, w2_block,
        node_index=node_index)
    jax.block_until_ready(probs)

    ref = reference_forward(x, node_index, adj_mask, type_index, a1, a2)
    assert probs.shape == (B, node_num)
    assert jnp.allclose(probs, ref, atol=1e-4, rtol=1e-4), (probs, ref)

    print("KERNEL_OK")
</pallas_src>

<mosaic_0001>
module attributes {stable_mosaic.version = 11 : i64} {
  func.func @_mtad_kernel(%arg0: i32, %arg1: memref<64x8xf32, #tpu.memory_space<vmem>>, %arg2: memref<4x1xi32, #tpu.memory_space<vmem>>, %arg3: memref<8x48xf32, #tpu.memory_space<vmem>>, %arg4: memref<8x48xf32, #tpu.memory_space<vmem>>, %arg5: memref<48x3xf32, #tpu.memory_space<vmem>>, %arg6: memref<1x16x1xf32, #tpu.memory_space<vmem>>, %arg7: memref<4x16x1xf32, #tpu.memory_space<vmem>>) attributes {dimension_semantics = [#tpu.dimension_semantics<parallel>], iteration_bounds = array<i64: 1>, scalar_prefetch = 0 : i64, scratch_operands = 0 : i64, tpu.core_type = #tpu.core_type<tc>, window_params = [{transform_indices = @transform_0, window_bounds = array<i64: 64, 8>}, {transform_indices = @transform_1, window_bounds = array<i64: 4, 1>}, {pipeline_mode = #tpu.pipeline_mode<synchronous>, transform_indices = @transform_2, window_bounds = array<i64: 8, 48>}, {pipeline_mode = #tpu.pipeline_mode<synchronous>, transform_indices = @transform_3, window_bounds = array<i64: 8, 48>}, {pipeline_mode = #tpu.pipeline_mode<synchronous>, transform_indices = @transform_4, window_bounds = array<i64: 48, 3>}, {pipeline_mode = #tpu.pipeline_mode<synchronous>, transform_indices = @transform_5, window_bounds = array<i64: 1, 16, 1>}, {transform_indices = @transform_6, window_bounds = array<i64: 4, 16, 1>}]} {
    %c0 = arith.constant 0 : index
    %c0_0 = arith.constant 0 : index
    %0 = vector.load %arg1[%c0, %c0_0] : memref<64x8xf32, #tpu.memory_space<vmem>>, vector<64x8xf32>
    %1 = vector.shape_cast %0 : vector<64x8xf32> to vector<4x16x8xf32>
    %2 = tpu.iota {dimensions = array<i32: 1>} : vector<1x16x1xi32>
    %c5_i32 = arith.constant 5 : i32
    %3 = vector.broadcast %c5_i32 : i32 to vector<1x16x1xi32>
    %4 = arith.cmpi eq, %2, %3 : vector<1x16x1xi32>
    %5 = arith.extui %4 : vector<1x16x1xi1> to vector<1x16x1xi32>
    %6 = arith.sitofp %5 : vector<1x16x1xi32> to vector<1x16x1xf32>
    %7 = vector.broadcast %6 : vector<1x16x1xf32> to vector<4x16x8xf32>
    %8 = arith.mulf %1, %7 : vector<4x16x8xf32>
    %cst = arith.constant dense<0.000000e+00> : vector<4x8xf32>
    %9 = vector.multi_reduction <add>, %8, %cst [1] : vector<4x16x8xf32> to vector<4x8xf32>
    %c0_1 = arith.constant 0 : index
    %c0_2 = arith.constant 0 : index
    %10 = vector.load %arg3[%c0_1, %c0_2] : memref<8x48xf32, #tpu.memory_space<vmem>>, vector<8x48xf32>
    %cst_3 = arith.constant dense<0.000000e+00> : vector<4x48xf32>
    %11 = tpu.matmul %9, %10, %cst_3 {dimension_numbers = #tpu.dot_dimension_numbers<[1], [0], [0], [1], [0, 0, 1, 1], [], []>} : vector<4x8xf32>, vector<8x48xf32>, vector<4x48xf32> -> vector<4x48xf32>
    %c0_4 = arith.constant 0 : index
    %c0_5 = arith.constant 0 : index
    %12 = vector.load %arg4[%c0_4, %c0_5] : memref<8x48xf32, #tpu.memory_space<vmem>>, vector<8x48xf32>
    %cst_6 = arith.constant dense<0.000000e+00> : vector<64x48xf32>
    %13 = tpu.matmul %0, %12, %cst_6 {dimension_numbers = #tpu.dot_dimension_numbers<[1], [0], [0], [1], [0, 0, 1, 1], [], []>} : vector<64x8xf32>, vector<8x48xf32>, vector<64x48xf32> -> vector<64x48xf32>
    %14 = vector.shape_cast %13 : vector<64x48xf32> to vector<4x16x48xf32>
    %15 = vector.shape_cast %11 : vector<4x48xf32> to vector<4x1x48xf32>
    %16 = vector.broadcast %15 : vector<4x1x48xf32> to vector<4x16x48xf32>
    %17 = arith.addf %14, %16 : vector<4x16x48xf32>
    %cst_7 = arith.constant 0.00999999977 : f32
    %18 = vector.broadcast %cst_7 : f32 to vector<4x16x48xf32>
    %19 = arith.mulf %18, %17 : vector<4x16x48xf32>
    %20 = arith.maximumf %17, %19 : vector<4x16x48xf32>
    %21 = vector.shape_cast %20 : vector<4x16x48xf32> to vector<64x48xf32>
    %c0_8 = arith.constant 0 : index
    %c0_9 = arith.constant 0 : index
    %22 = vector.load %arg5[%c0_8, %c0_9] : memref<48x3xf32, #tpu.memory_space<vmem>>, vector<48x3xf32>
    %cst_10 = arith.constant dense<0.000000e+00> : vector<64x3xf32>
    %23 = tpu.matmul %21, %22, %cst_10 {dimension_numbers = #tpu.dot_dimension_numbers<[1], [0], [0], [1], [0, 0, 1, 1], [], []>} : vector<64x48xf32>, vector<48x3xf32>, vector<64x3xf32> -> vector<64x3xf32>
    %cst_11 = arith.constant 0.00999999977 : f32
    %24 = vector.broadcast %cst_11 : f32 to vector<64x3xf32>
    %25 = arith.mulf %24, %23 : vector<64x3xf32>
    %26 = arith.maximumf %23, %25 : vector<64x3xf32>
    %27 = tpu.iota {dimensions = array<i32: 1>} : vector<4x3xi32>
    %c0_12 = arith.constant 0 : index
    %c0_13 = arith.constant 0 : index
    %28 = vector.load %arg2[%c0_12, %c0_13] : memref<4x1xi32, #tpu.memory_space<vmem>>, vector<4x1xi32>
    %29 = vector.broadcast %28 : vector<4x1xi32> to vector<4x3xi32>
    %30 = arith.cmpi eq, %27, %29 : vector<4x3xi32>
    %31 = arith.extui %30 : vector<4x3xi1> to vector<4x3xi32>
    %32 = arith.sitofp %31 : vector<4x3xi32> to vector<4x3xf32>
    %33 = vector.shape_cast %26 : vector<64x3xf32> to vector<4x16x3xf32>
    %34 = vector.shape_cast %32 : vector<4x3xf32> to vector<4x1x3xf32>
    %35 = vector.broadcast %34 : vector<4x1x3xf32> to vector<4x16x3xf32>
    %36 = arith.mulf %33, %35 : vector<4x16x3xf32>
    %cst_14 = arith.constant dense<0.000000e+00> : vector<4x16xf32>
    %37 = vector.multi_reduction <add>, %36, %cst_14 [2] : vector<4x16x3xf32> to vector<4x16xf32>
    %38 = vector.shape_cast %37 : vector<4x16xf32> to vector<4x16x1xf32>
    %c0_15 = arith.constant 0 : index
    %c0_16 = arith.constant 0 : index
    %c0_17 = arith.constant 0 : index
    %39 = vector.load %arg6[%c0_15, %c0_16, %c0_17] : memref<1x16x1xf32, #tpu.memory_space<vmem>>, vector<1x16x1xf32>
    %cst_18 = arith.constant 0.000000e+00 : f32
    %40 = vector.broadcast %cst_18 : f32 to vector<1x16x1xf32>
    %41 = arith.cmpf ogt, %39, %40 : vector<1x16x1xf32>
    %cst_19 = arith.constant -9.000000e+15 : f32
    %42 = vector.broadcast %cst_19 : f32 to vector<4x16x1xf32>
    %43 = vector.shape_cast %41 : vector<1x16x1xi1> to vector<1x16x1xi1>
    %44 = vector.broadcast %43 : vector<1x16x1xi1> to vector<4x16x1xi1>
    %45 = arith.select %44, %38, %42 : vector<4x16x1xi1>, vector<4x16x1xf32>
    %cst_20 = arith.constant dense<0xFF800000> : vector<4x1xf32>
    %46 = vector.multi_reduction <maximumf>, %45, %cst_20 [1] : vector<4x16x1xf32> to vector<4x1xf32>
    %47 = vector.shape_cast %46 : vector<4x1xf32> to vector<4x1x1xf32>
    %48 = vector.broadcast %47 : vector<4x1x1xf32> to vector<4x16x1xf32>
    %49 = arith.subf %45, %48 : vector<4x16x1xf32>
    %50 = math.exp %49 : vector<4x16x1xf32>
    %cst_21 = arith.constant dense<0.000000e+00> : vector<4x1xf32>
    %51 = vector.multi_reduction <add>, %50, %cst_21 [1] : vector<4x16x1xf32> to vector<4x1xf32>
    %52 = vector.shape_cast %51 : vector<4x1xf32> to vector<4x1x1xf32>
    %53 = tpu.reciprocal %52 {approx = true} : vector<4x1x1xf32> -> vector<4x1x1xf32>
    %54 = arith.mulf %52, %53 : vector<4x1x1xf32>
    %cst_22 = arith.constant 2.000000e+00 : f32
    %55 = vector.broadcast %cst_22 : f32 to vector<4x1x1xf32>
    %56 = arith.subf %55, %54 : vector<4x1x1xf32>
    %57 = arith.mulf %53, %56 : vector<4x1x1xf32>
    %58 = vector.broadcast %57 : vector<4x1x1xf32> to vector<4x16x1xf32>
    %59 = arith.mulf %50, %58 : vector<4x16x1xf32>
    %60 = vector.broadcast %39 : vector<1x16x1xf32> to vector<4x16x1xf32>
    %61 = arith.mulf %59, %60 : vector<4x16x1xf32>
    %c0_23 = arith.constant 0 : index
    %c0_24 = arith.constant 0 : index
    %c0_25 = arith.constant 0 : index
    %62 = vector.load %arg7[%c0_23, %c0_24, %c0_25] : memref<4x16x1xf32, #tpu.memory_space<vmem>>, vector<4x16x1xf32>
    tpu.vector_store %arg7[%c0_23, %c0_24, %c0_25], %61 {strides = array<i32>} : memref<4x16x1xf32, #tpu.memory_space<vmem>>, vector<4x16x1xf32>,
    return
  }
  func.func @transform_0(%arg0: i32) -> (i32, i32) {
    %c0_i32 = arith.constant 0 : i32
    %c0_i32_0 = arith.constant 0 : i32
    return %arg0, %c0_i32 : i32, i32
  }
  func.func @transform_1(%arg0: i32) -> (i32, i32) {
    %c0_i32 = arith.constant 0 : i32
    %c0_i32_0 = arith.constant 0 : i32
    return %arg0, %c0_i32 : i32, i32
  }
  func.func @transform_2(%arg0: i32) -> (i32, i32) {
    %c0_i32 = arith.constant 0 : i32
    %c0_i32_0 = arith.constant 0 : i32
    %c0_i32_1 = arith.constant 0 : i32
    return %c0_i32, %c0_i32_0 : i32, i32
  }
  func.func @transform_3(%arg0: i32) -> (i32, i32) {
    %c0_i32 = arith.constant 0 : i32
    %c0_i32_0 = arith.constant 0 : i32
    %c0_i32_1 = arith.constant 0 : i32
    return %c0_i32, %c0_i32_0 : i32, i32
  }
  func.func @transform_4(%arg0: i32) -> (i32, i32) {
    %c0_i32 = arith.constant 0 : i32
    %c0_i32_0 = arith.constant 0 : i32
    %c0_i32_1 = arith.constant 0 : i32
    return %c0_i32, %c0_i32_0 : i32, i32
  }
  func.func @transform_5(%arg0: i32) -> (i32, i32, i32) {
    %c0_i32 = arith.constant 0 : i32
    %c0_i32_0 = arith.constant 0 : i32
    %c0_i32_1 = arith.constant 0 : i32
    %c0_i32_2 = arith.constant 0 : i32
    return %c0_i32, %c0_i32_0, %c0_i32_1 : i32, i32, i32
  }
  func.func @transform_6(%arg0: i32) -> (i32, i32, i32) {
    %c0_i32 = arith.constant 0 : i32
    %c0_i32_0 = arith.constant 0 : i32
    %c0_i32_1 = arith.constant 0 : i32
    return %arg0, %c0_i32, %c0_i32_0 : i32, i32, i32
  }
}

</mosaic_0001>

<bundles_post_ra>
// kernel: multi_type_attention_forward.1
= control target key start
LH: loop header
LB: loop body
LE: loop exit
PB: predicated region body
PF: predicated region fallthrough
CT: control target
= control target key end

     0   :  { %v31_v0 = vlaneseq  ;;  %vm48_vm0 = vcmask 64512   ;;  %v897_v4 = vmov 0.0   ;;  %vm898_vm1 = vmmov 0   ;;  %s1141_s3 = inlined_call_operand.vmem [shape: f32[8,48], index: 3, kind: input, shape index: {}]   ;;  %s1142_s0 = inlined_call_operand.vmem [shape: f32[64,8], index: 0, kind: input, shape index: {}]   ;;  %s1143_s2 = inlined_call_operand.vmem [shape: f32[8,48], index: 2, kind: input, shape index: {}]   ;;  %s1144_s4 = inlined_call_operand.vmem [shape: f32[48,3], index: 4, kind: input, shape index: {}]   ;;  %s1145_s1 = inlined_call_operand.vmem [shape: s32[4,1], index: 1, kind: input, shape index: {}]   ;;  %s1146_s5 = inlined_call_operand.vmem [shape: f32[1,16,1], index: 5, kind: input, shape index: {}]   ;;  %s1147_s6 = inlined_call_operand.vmem [shape: f32[4,16,1], index: 6, kind: output, shape index: {}]  }
   0x1   :  { %v168_v1 = vld [vmem:[%s1141_s3] sm:$0xff]  ;;  %v25_v3 = vld [vmem:[%s1142_s0 + $0x10] sm:$0xff]  ;;  %807 = vmatprep.subr.mxu0 %v897_v4  ;;  %v26_v5 = vld [vmem:[%s1142_s0 + $0x18] sm:$0xff]  ;;  %809 = vmatprep.mubr.msk.f32.mxu0 %vm898_vm1, %v897_v4  ;;  %vm90_vm3 = vcmask 1041409   ;;  %vm92_vm4 = vcmask 1042434   ;;  %vm94_vm5 = vcmask 1043459  }
   0x2   :  { %v23_v2 = vld [vmem:[%s1142_s0] sm:$0xff]  ;;  %812 = vmatprep.subr.mxu1 %v168_v1  ;;  %v28_v7 = vld [vmem:[%s1142_s0 + $0x28] sm:$0xff]  ;;  %v956_v8 = vshrl.u32 %v31_v0, 7  ;;  %v29_v9 = vld [vmem:[%s1142_s0 + $0x30] sm:$0xff]  ;;  %v43_v11 = vmul.f32 0.0, %v26_v5  ;;  %vm373_vm6 = vcmask 392192  }
   0x3   :  { %v27_v6 = vld [vmem:[%s1142_s0 + $0x20] sm:$0xff]  ;;  %814 = vmatprep.mubr.msk.f32.mxu1 %vm48_vm0, %v23_v2  ;;  %813 = vmatpush3.msra.mxu1 %v168_v1  ;;  %v30_v10 = vld [vmem:[%s1142_s0 + $0x38] sm:$0xff]  ;;  %v45_v12 = vmul.f32 0.0, %v28_v7  ;;  %v24_v13 = vld [vmem:[%s1142_s0 + $0x8] sm:$0xff]  ;;  %vm581_vm8 = vcmask 23552   ;;  %vm622_vm10 = vcmask 7168  }
   0x4   :  { %vm34_vm2 = vcmp.eq.s32.totalorder %v956_v8, 5  ;;  %v47_v14 = vmul.f32 0.0, %v30_v10  ;;  %v41_v15 = vmul.f32 0.0, %v24_v13  ;;  %815 = vmatmul.mubr.msk.f32.vlgmr.msra.gmra.mrb[0].mxu1 %vm48_vm0, %v24_v13  ;;  %v85_v16 = vld [vmem:[%s1143_s2] sm:$0xff]  ;;  %v59_v18 = vsel %vm48_vm0, %v43_v11, 0.0  ;;  %v368_v62 = vld [vmem:[%s1144_s4 + $0x8] sm:$0xff] }
   0x5   :  { %v763_v17 = vsel %vm34_vm2, 1.0, %v897_v4  ;;  %v68_v19 = vsel %vm48_vm0, %v45_v12, 0.0  ;;  %808 = vmatpush3.msra.mxu0 %v85_v16  ;;  %817 = vmatprep.mubr.msk.f32.mxu1 %vm48_vm0, %v25_v3  ;;  %v367_v61 = vld [vmem:[%s1144_s4] sm:$0xff]  ;;  %v369_v1 = vld [vmem:[%s1144_s4 + $0x10] sm:$0xff] }
   0x6   :  { %v40_v20 = vmul.f32 %v763_v17, %v23_v2  ;;  %v42_v21 = vmul.f32 %v763_v17, %v25_v3  ;;  %v44_v22 = vmul.f32 %v763_v17, %v27_v6  ;;  %v46_v23 = vmul.f32 %v763_v17, %v29_v9  ;;  %v370_v2 = vld [vmem:[%s1144_s4 + $0x18] sm:$0xff] }
   0x7   :  { %v77_v24 = vsel %vm48_vm0, %v47_v14, 0.0  ;;  %v50_v25 = vsel %vm48_vm0, %v41_v15, 0.0  ;;  %v850_v63 = vpack.c.bf16 %v368_v62, %v367_v61  ;;  %v854_v3 = vpack.c.bf16 %v370_v2, %v369_v1 }
   0x8   :  { %v49_v26 = vsel %vm48_vm0, %v40_v20, 0.0  ;;  %v58_v27 = vsel %vm48_vm0, %v42_v21, 0.0  ;;  %v67_v28 = vsel %vm48_vm0, %v44_v22, 0.0  ;;  %v76_v29 = vsel %vm48_vm0, %v46_v23, 0.0  ;;  %818 = vmatmul.mubr.msk.f32.gmra.mrb[2].mxu1 %vm48_vm0, %v26_v5  ;;  %v371_v5 = vld [vmem:[%s1144_s4 + $0x20] sm:$0xff] }
   0x9   :  { %v60_v30 = vadd.f32 %v59_v18, %v58_v27  ;;  %v69_v31 = vadd.f32 %v68_v19, %v67_v28  ;;  %v78_v32 = vadd.f32 %v77_v24, %v76_v29  ;;  %v51_v33 = vadd.f32 %v50_v25, %v49_v26  ;;  %820 = vmatprep.mubr.msk.f32.mxu1 %vm48_vm0, %v27_v6  ;;  %v372_v6 = vld [vmem:[%s1144_s4 + $0x28] sm:$0xff] }
   0xa   :  { %851 = vmatprep.subr.bf16.mxu0 %v850_v63  ;;  %862 = vmatprep.subr.bf16.mxu1 %v850_v63  ;;  %v900_v17 = vmov 1966171168   ;;  %v1013_v24 = vsub.s32 0, %v956_v8 }
   0xb   :  { %v61_v34 = vrot.slane %v60_v30, 4  ;;  %v70_v35 = vrot.slane %v69_v31, 4  ;;  %v52_v36 = vrot.slane %v51_v33, 4  ;;  %v79_v37 = vrot.slane %v78_v32, 4  ;;  %865 = vmatpush3.bf16.msra.mxu1 %v850_v63 }
   0xc   :  { %821 = vmatmul.mubr.msk.f32.gmra.mrb[4].mxu1 %vm48_vm0, %v28_v7  ;;  %863 = vmatprep.subr.bf16.mxu1 %v854_v3  ;;  %v858_v7 = vpack.c.bf16 %v372_v6, %v371_v5  ;;  %v300_v18 = vunpack.c.l.s4 %v900_v17 }
   0xd   :  { %v62_v38 = vadd.f32 %v61_v34, %v60_v30  ;;  %v53_v39 = vadd.f32 %v52_v36, %v51_v33  ;;  %v71_v40 = vadd.f32 %v70_v35, %v69_v31  ;;  %v80_v41 = vadd.f32 %v79_v37, %v78_v32  ;;  %823 = vmatprep.mubr.msk.f32.mxu1 %vm48_vm0, %v29_v9 }
   0xe   :  { %v899_v9 = vmov 0   ;;  %v301_v21 = vunpack.c.0.s8 %v300_v18 }
   0xf   :  { %v54_v42 = vrot.slane %v53_v39, 2  ;;  %v63_v43 = vrot.slane %v62_v38, 2  ;;  %v72_v44 = vrot.slane %v71_v40, 2  ;;  %v81_v45 = vrot.slane %v80_v41, 2  ;;  %866 = vmatpush3.bf16.msra.mxu1 %v854_v3  ;;  %872 = vset.pattern.permute.xlu0 %v899_v9 }
  0x10   :  { %824 = vmatmul.mubr.msk.f32.gmra.mrb[6].mxu1 %vm48_vm0, %v30_v10  ;;  %864 = vmatprep.subr.bf16.mxu1 %v858_v7  ;;  %v521_v10 = vld [vmem:[%s1145_s1] sm:$0xf]  ;;  %v304_v22 = vsub.s32 %v301_v21, %v956_v8 }
  0x11   :  { %v55_v46 = vadd.f32 %v54_v42, %v53_v39  ;;  %v64_v47 = vadd.f32 %v63_v43, %v62_v38  ;;  %v73_v48 = vadd.f32 %v72_v44, %v71_v40  ;;  %v82_v49 = vadd.f32 %v81_v45, %v80_v41  ;;  %523 = vperm.xlu0 %872, %v521_v10  }
  0x13   :  { %v56_v50 = vrot.slane %v55_v46, 1  ;;  %v65_v51 = vrot.slane %v64_v47, 1  ;;  %v74_v52 = vrot.slane %v73_v48, 1  ;;  %v83_v53 = vrot.slane %v82_v49, 1  ;;  %867 = vmatpush3.bf16.msra.mxu1 %v858_v7 }
  0x15   :  { %v57_v54 = vadd.f32 %v56_v50, %v55_v46  ;;  %v66_v55 = vadd.f32 %v65_v51, %v64_v47  ;;  %v75_v56 = vadd.f32 %v74_v52, %v73_v48  ;;  %v84_v57 = vadd.f32 %v83_v53, %v82_v49 }
  0x17   :  { %v91_v58 = vsel %vm90_vm3, %v66_v55, %v57_v54 }
  0x18   :  { %v93_v59 = vsel %vm92_vm4, %v75_v56, %v91_v58 }
  0x19   :  { %v95_v60 = vsel %vm94_vm5, %v84_v57, %v93_v59  ;;  %v520_v59 = vand.u32 127, %v31_v0 }
  0x1a   :  { %810 = vmatmul.mubr.msk.f32.vlgmr.msra.gmra.mrb[0].mxu0 %vm48_vm0, %v95_v60 }
  0x1b   :  { %853 = vmatpush3.bf16.msra.mxu0 %v850_v63 }
  0x1c   :  { %855 = vmatprep.subr.bf16.mxu0 %v854_v3 }
  0x1f   :  { %857 = vmatpush3.bf16.msra.mxu0 %v854_v3 }
  0x20   :  { %859 = vmatprep.subr.bf16.mxu0 %v858_v7 }
  0x23   :  { %861 = vmatpush3.bf16.msra.mxu0 %v858_v7 }
  0x90   :  { %v524_v60 = vpop.permute.xlu0 %523 }
  0x91   :  { %vm525_vm7 = vcmp.eq.s32.totalorder %v520_v59, %v524_v60 }
  0x92   :  { %v781_v61 = vsel %vm525_vm7, 1.0, %v897_v4 }
  0x93   :  { %v535_v62 = vrot.slane %v781_v61, %v304_v22 }
  0x95   :  { %v543_v63 = vrot.slane %v535_v62, %v304_v22  ;;  %v536_v1 = vcombine.high %v535_v62, %v535_v62 }
  0x97   :  { %v556_v6 = vrot.slane %v543_v63, %v1013_v24  ;;  %v550_v9 = vrot.slane %v536_v1, %v304_v22 }
  0x99   :  { %v552_v18 = vcombine.high %v550_v9, %v550_v9 }
  0xd7   :  { %v816_v11 = vpop.f32.mrb[0].mxu1 }
  0xd8   :  { %v259_v12 = vpop.f32.mrb[1].mxu1 }
  0xdb   :  { %v819_v13 = vpop.f32.mrb[2].mxu1 }
  0xdc   :  { %v269_v14 = vpop.f32.mrb[3].mxu1 }
  0xdf   :  { %v822_v15 = vpop.f32.mrb[4].mxu1 }
  0xe0   :  { %v279_v16 = vpop.f32.mrb[5].mxu1 }
  0xe3   :  { %v825_v19 = vpop.f32.mrb[6].mxu1 }
  0xe4   :  { %v289_v20 = vpop.f32.mrb[7].mxu1 }
  0xed   :  { %v164_v23 = vpop.f32.mrb[0].mxu0 }
  0xee   :  { %v305_v25 = vrot.slane %v164_v23, %v304_v22  ;;  %v811_v26 = vpop.f32.mrb[1].mxu0  ;;  %v560_v23 = vrot.slane %v550_v9, %v1013_v24 }
  0xf0   :  { %v306_v27 = vcombine.high %v305_v25, %v305_v25  ;;  %v313_v28 = vrot.slane %v305_v25, %v304_v22 }
  0xf2   :  { %v326_v29 = vrot.slane %v313_v28, %v1013_v24  ;;  %v320_v30 = vrot.slane %v306_v27, %v304_v22  ;;  %v321_v31 = vcombine.high %v313_v28, %v313_v28 }
  0xf4   :  { %v344_v32 = vadd.f32 %v816_v11, %v326_v29  ;;  %v343_v33 = vadd.f32 %v326_v29, %v259_v12  ;;  %v330_v34 = vrot.slane %v320_v30, %v1013_v24  ;;  %v334_v35 = vrot.slane %v321_v31, %v1013_v24 }
  0xf5   :  { %v322_v36 = vcombine.high %v320_v30, %v320_v30  ;;  %v568_v29 = vrot.slane %v552_v18, %v1013_v24 }
  0xf6   :  { %v352_v37 = vmul.f32 0.01, %v344_v32  ;;  %v351_v38 = vmul.f32 0.01, %v343_v33  ;;  %v346_v39 = vadd.f32 %v819_v13, %v330_v34  ;;  %v345_v8 = vadd.f32 %v330_v34, %v269_v14 }
  0xf7   :  { %v348_v40 = vadd.f32 %v822_v15, %v334_v35  ;;  %v347_v41 = vadd.f32 %v334_v35, %v279_v16  ;;  %v338_v42 = vrot.slane %v322_v36, %v1013_v24  ;;  %v551_v34 = vcombine.high %v543_v63, %v543_v63 }
  0xf8   :  { %v360_v43 = vmax.f32 %v344_v32, %v352_v37  ;;  %v359_v44 = vmax.f32 %v343_v33, %v351_v38  ;;  %v353_v45 = vmul.f32 0.01, %v345_v8  ;;  %v354_v46 = vmul.f32 0.01, %v346_v39 }
  0xf9   :  { %v350_v47 = vadd.f32 %v825_v19, %v338_v42  ;;  %v349_v48 = vadd.f32 %v338_v42, %v289_v20  ;;  %v355_v50 = vmul.f32 0.01, %v347_v41  ;;  %v356_v54 = vmul.f32 0.01, %v348_v40 }
  0xfa   :  { %v361_v49 = vmax.f32 %v345_v8, %v353_v45  ;;  %838 = vmatprep.mubr.msk.f32.mxu0 %vm373_vm6, %v359_v44  ;;  %v362_v53 = vmax.f32 %v346_v39, %v354_v46  ;;  %v564_v39 = vrot.slane %v551_v34, %v1013_v24  ;;  %v1044_v24 = vld [vmem:[%s1146_s5 + $0x8] sm:$0xff] }
  0xfb   :  { %v358_v51 = vmul.f32 0.01, %v350_v47  ;;  %v357_v52 = vmul.f32 0.01, %v349_v48  ;;  %839 = vmatmul.mubr.msk.f32.vlgmr.msra.gmra.mrb[2].mxu0 %vm373_vm6, %v360_v43  ;;  %v363_v57 = vmax.f32 %v347_v41, %v355_v50  ;;  %v364_v58 = vmax.f32 %v348_v40, %v356_v54 }
  0xfc   :  { %841 = vmatprep.mubr.msk.f32.mxu0 %vm373_vm6, %v361_v49  ;;  %v1049_v49 = vld [vmem:[%s1146_s5] sm:$0xff]  ;;  %vm609_vm9 = vcmp.gt.f32.partialorder %v1044_v24, 0.0 }
  0xfd   :  { %v366_v55 = vmax.f32 %v350_v47, %v358_v51  ;;  %v365_v56 = vmax.f32 %v349_v48, %v357_v52  ;;  %vm608_vm11 = vcmp.gt.f32.partialorder %v1049_v49, 0.0 }
  0xff   :  { %847 = vmatprep.mubr.msk.f32.mxu1 %vm373_vm6, %v365_v56  ;;  %842 = vmatmul.mubr.msk.f32.gmra.mrb[4].mxu0 %vm373_vm6, %v362_v53 }
 0x100   :  { %848 = vmatmul.mubr.msk.f32.vlgmr.msra.gmra.mrb[8].mxu1 %vm373_vm6, %v366_v55  ;;  %844 = vmatprep.mubr.msk.f32.mxu0 %vm373_vm6, %v363_v57 }
 0x103   :  { %845 = vmatmul.mubr.msk.f32.gmra.mrb[6].mxu0 %vm373_vm6, %v364_v58 }
 0x1ce   :  { %v840_v2 = vpop.f32.mrb[2].mxu0 }
 0x1cf   :  { %v504_v3 = vmul.f32 0.01, %v840_v2  ;;  %v464_v5 = vpop.f32.mrb[3].mxu0 }
 0x1d0   :  { %v503_v7 = vmul.f32 0.01, %v464_v5 }
 0x1d1   :  { %v512_v10 = vmax.f32 %v840_v2, %v504_v3 }
 0x1d2   :  { %v511_v11 = vmax.f32 %v464_v5, %v503_v7  ;;  %v843_v12 = vpop.f32.mrb[4].mxu0 }
 0x1d3   :  { %v506_v13 = vmul.f32 0.01, %v843_v12  ;;  %v849_v0 = vpop.f32.mrb[8].mxu1  ;;  %v474_v14 = vpop.f32.mrb[5].mxu0  ;;  %v574_v15 = vmul.f32 %v556_v6, %v512_v10 }
 0x1d4   :  { %v505_v16 = vmul.f32 0.01, %v474_v14  ;;  %v494_v4 = vpop.f32.mrb[9].mxu1  ;;  %v573_v17 = vmul.f32 %v556_v6, %v511_v11  ;;  %v510_v8 = vmul.f32 0.01, %v849_v0 }
 0x1d5   :  { %v514_v19 = vmax.f32 %v843_v12, %v506_v13  ;;  %v509_v20 = vmul.f32 0.01, %v494_v4  ;;  %v585_v21 = vsel %vm581_vm8, %v574_v15, 0.0 }
 0x1d6   :  { %v513_v25 = vmax.f32 %v474_v14, %v505_v16  ;;  %586 = vadd.xlane.f32.xlu1 %v585_v21  ;;  %v846_v22 = vpop.f32.mrb[6].mxu0  ;;  %v582_v26 = vsel %vm581_vm8, %v573_v17, 0.0  ;;  %v518_v43 = vmax.f32 %v849_v0, %v510_v8 }
 0x1d7   :  { %583 = vadd.xlane.f32.xlu0 %v582_v26  ;;  %v484_v27 = vpop.f32.mrb[7].mxu0  ;;  %v576_v28 = vmul.f32 %v560_v23, %v514_v19  ;;  %v517_v30 = vmax.f32 %v494_v4, %v509_v20  ;;  %v508_v31 = vmul.f32 0.01, %v846_v22 }
 0x1d8   :  { %v575_v33 = vmul.f32 %v560_v23, %v513_v25  ;;  %v507_v36 = vmul.f32 0.01, %v484_v27  ;;  %v580_v47 = vmul.f32 %v568_v29, %v518_v43 }
 0x1d9   :  { %v591_v32 = vsel %vm581_vm8, %v576_v28, 0.0  ;;  %v516_v35 = vmax.f32 %v846_v22, %v508_v31  ;;  %v579_v38 = vmul.f32 %v568_v29, %v517_v30 }
 0x1da   :  { %592 = vadd.xlane.f32.xlu1 %v591_v32  ;;  %v588_v37 = vsel %vm581_vm8, %v575_v33, 0.0  ;;  %v515_v40 = vmax.f32 %v484_v27, %v507_v36  ;;  %v603_v48 = vsel %vm581_vm8, %v580_v47, 0.0 }
 0x1db   :  { %v600_v41 = vsel %vm581_vm8, %v579_v38, 0.0  ;;  %v578_v42 = vmul.f32 %v564_v39, %v516_v35 }
 0x1dc   :  { %v577_v45 = vmul.f32 %v564_v39, %v515_v40 }
 0x1dd   :  { %v597_v44 = vsel %vm581_vm8, %v578_v42, 0.0 }
 0x1de   :  { %589 = vadd.xlane.f32.xlu1 %v588_v37  ;;  %v594_v46 = vsel %vm581_vm8, %v577_v45, 0.0 }
 0x1e2   :  { %601 = vadd.xlane.f32.xlu1 %v600_v41 }
 0x1e6   :  { %598 = vadd.xlane.f32.xlu1 %v597_v44 }
 0x1ea   :  { %595 = vadd.xlane.f32.xlu1 %v594_v46 }
 0x1ee   :  { %604 = vadd.xlane.f32.xlu1 %v603_v48 }
 0x263   :  { %v587_v50 = vpop.xlane.xlu1 %586 }
 0x264   :  { %v615_v51 = vsel %vm609_vm9, %v587_v50, -9e+15  ;;  %v584_v52 = vpop.xlane.xlu0 %583 }
 0x265   :  { %v624_v53 = vsel %vm622_vm10, %v615_v51, -inf  ;;  %v614_v54 = vsel %vm608_vm11, %v584_v52, -9e+15 }
 0x266   :  { %v623_v55 = vsel %vm622_vm10, %v614_v54, -inf }
 0x267   :  { %v625_v56 = vmax.f32 %v623_v55, %v624_v53  ;;  %v593_v57 = vpop.xlane.xlu1 %592 }
 0x268   :  { %v617_v59 = vsel %vm609_vm9, %v593_v57, -9e+15 }
 0x269   :  { %v626_v58 = vrot.slane %v625_v56, 4  ;;  %v633_v1 = vsel %vm622_vm10, %v617_v59, -inf }
 0x26b   :  { %v627_v60 = vmax.f32 %v625_v56, %v626_v58  ;;  %v590_v61 = vpop.xlane.xlu1 %589 }
 0x26c   :  { %v616_v62 = vsel %vm608_vm11, %v590_v61, -9e+15 }
 0x26d   :  { %v628_v63 = vrot.slane %v627_v60, 2  ;;  %v632_v2 = vsel %vm622_vm10, %v616_v62, -inf }
 0x26e   :  { %v634_v3 = vmax.f32 %v632_v2, %v633_v1 }
 0x26f   :  { %v629_v5 = vmax.f32 %v627_v60, %v628_v63  ;;  %v602_v6 = vpop.xlane.xlu1 %601 }
 0x270   :  { %v635_v7 = vrot.slane %v634_v3, 4  ;;  %v620_v22 = vsel %vm608_vm11, %v602_v6, -9e+15 }
 0x271   :  { %v630_v9 = vrot.slane %v629_v5, 1  ;;  %v650_v32 = vsel %vm622_vm10, %v620_v22, -inf }
 0x272   :  { %v636_v10 = vmax.f32 %v634_v3, %v635_v7 }
 0x273   :  { %v631_v11 = vmax.f32 %v629_v5, %v630_v9  ;;  %v599_v12 = vpop.xlane.xlu1 %598 }
 0x274   :  { %v637_v13 = vrot.slane %v636_v10, 2  ;;  %v619_v16 = vsel %vm609_vm9, %v599_v12, -9e+15 }
 0x275   :  { %v659_v0 = vsub.f32 %v614_v54, %v631_v11  ;;  %v660_v14 = vsub.f32 %v615_v51, %v631_v11  ;;  %v642_v21 = vsel %vm622_vm10, %v619_v16, -inf }
 0x276   :  { %v638_v15 = vmax.f32 %v636_v10, %v637_v13 }
 0x277   :  { %v667_v4 = vmul.f32 1.442695, %v659_v0  ;;  %v669_v17 = vmul.f32 1.442695, %v660_v14  ;;  %v596_v18 = vpop.xlane.xlu1 %595 }
 0x278   :  { %v639_v19 = vrot.slane %v638_v15, 1  ;;  %v618_v20 = vsel %vm608_vm11, %v596_v18, -9e+15 }
 0x279   :  { %873 = vpow2.f32 %v667_v4  ;;  %v641_v23 = vsel %vm622_vm10, %v618_v20, -inf }
 0x27a   :  { %875 = vpow2.f32 %v669_v17  ;;  %v640_v25 = vmax.f32 %v638_v15, %v639_v19  ;;  %v643_v26 = vmax.f32 %v641_v23, %v642_v21 }
 0x27b   :  { %v605_v27 = vpop.xlane.xlu1 %604 }
 0x27c   :  { %v661_v28 = vsub.f32 %v616_v62, %v640_v25  ;;  %v662_v29 = vsub.f32 %v617_v59, %v640_v25  ;;  %v644_v30 = vrot.slane %v643_v26, 4  ;;  %v621_v31 = vsel %vm609_vm9, %v605_v27, -9e+15 }
 0x27d   :  { %v651_v33 = vsel %vm622_vm10, %v621_v31, -inf }
 0x27e   :  { %v671_v34 = vmul.f32 1.442695, %v661_v28  ;;  %v673_v35 = vmul.f32 1.442695, %v662_v29  ;;  %v645_v36 = vmax.f32 %v643_v26, %v644_v30  ;;  %v652_v37 = vmax.f32 %v650_v32, %v651_v33 }
 0x280   :  { %877 = vpow2.f32 %v671_v34  ;;  %v646_v38 = vrot.slane %v645_v36, 2  ;;  %v653_v39 = vrot.slane %v652_v37, 4 }
 0x281   :  { %879 = vpow2.f32 %v673_v35 }
 0x282   :  { %v647_v8 = vmax.f32 %v645_v36, %v646_v38  ;;  %v654_v40 = vmax.f32 %v652_v37, %v653_v39 }
 0x283   :  { %v1077_v41 = vpop.eup %873 }
 0x284   :  { %v1079_v42 = vpop.eup %875  ;;  %v683_v43 = vsel %vm622_vm10, %v1077_v41, 0.0  ;;  %v648_v44 = vrot.slane %v647_v8, 1  ;;  %v655_v45 = vrot.slane %v654_v40, 2 }
 0x285   :  { %v684_v46 = vsel %vm622_vm10, %v1079_v42, 0.0 }
 0x286   :  { %v685_v47 = vadd.f32 %v684_v46, %v683_v43  ;;  %v649_v48 = vmax.f32 %v647_v8, %v648_v44  ;;  %v656_v50 = vmax.f32 %v654_v40, %v655_v45 }
 0x288   :  { %v686_v51 = vrot.slane %v685_v47, 4  ;;  %v663_v52 = vsub.f32 %v618_v20, %v649_v48  ;;  %v664_v53 = vsub.f32 %v619_v16, %v649_v48  ;;  %v657_v54 = vrot.slane %v656_v50, 1 }
 0x28a   :  { %v1085_v55 = vpop.eup %877  ;;  %v687_v56 = vadd.f32 %v686_v51, %v685_v47  ;;  %v675_v57 = vmul.f32 1.442695, %v663_v52  ;;  %v677_v58 = vmul.f32 1.442695, %v664_v53  ;;  %v658_v59 = vmax.f32 %v656_v50, %v657_v54 }
 0x28b   :  { %v1087_v60 = vpop.eup %879  ;;  %v692_v61 = vsel %vm622_vm10, %v1085_v55, 0.0 }
 0x28c   :  { %v688_v62 = vrot.slane %v687_v56, 2  ;;  %v693_v63 = vsel %vm622_vm10, %v1087_v60, 0.0  ;;  %881 = vpow2.f32 %v675_v57  ;;  %v665_v1 = vsub.f32 %v620_v22, %v658_v59 }
 0x28d   :  { %v694_v2 = vadd.f32 %v693_v63, %v692_v61  ;;  %883 = vpow2.f32 %v677_v58  ;;  %v666_v3 = vsub.f32 %v621_v31, %v658_v59 }
 0x28e   :  { %v689_v5 = vadd.f32 %v688_v62, %v687_v56  ;;  %v679_v6 = vmul.f32 1.442695, %v665_v1 }
 0x28f   :  { %v695_v7 = vrot.slane %v694_v2, 4  ;;  %v681_v9 = vmul.f32 1.442695, %v666_v3 }
 0x290   :  { %v690_v10 = vrot.slane %v689_v5, 1  ;;  %885 = vpow2.f32 %v679_v6 }
 0x291   :  { %v696_v11 = vadd.f32 %v695_v7, %v694_v2  ;;  %887 = vpow2.f32 %v681_v9 }
 0x292   :  { %v691_v12 = vadd.f32 %v690_v10, %v689_v5 }
 0x293   :  { %v697_v13 = vrot.slane %v696_v11, 2 }
 0x294   :  { %889 = vrcp.f32 %v691_v12 }
 0x295   :  { %v698_v0 = vadd.f32 %v697_v13, %v696_v11 }
 0x296   :  { %v882_v14 = vpop.eup %881 }
 0x297   :  { %v884_v15 = vpop.eup %883  ;;  %v699_v16 = vrot.slane %v698_v0, 1  ;;  %v701_v4 = vsel %vm622_vm10, %v882_v14, 0.0 }
 0x298   :  { %v702_v17 = vsel %vm622_vm10, %v884_v15, 0.0 }
 0x299   :  { %v700_v18 = vadd.f32 %v699_v16, %v698_v0  ;;  %v703_v19 = vadd.f32 %v702_v17, %v701_v4 }
 0x29a   :  { %v886_v20 = vpop.eup %885 }
 0x29b   :  { %v888_v21 = vpop.eup %887  ;;  %891 = vrcp.f32 %v700_v18  ;;  %v704_v23 = vrot.slane %v703_v19, 4  ;;  %v710_v25 = vsel %vm622_vm10, %v886_v20, 0.0 }
 0x29c   :  { %v711_v22 = vsel %vm622_vm10, %v888_v21, 0.0 }
 0x29d   :  { %v705_v26 = vadd.f32 %v704_v23, %v703_v19  ;;  %v712_v27 = vadd.f32 %v711_v22, %v710_v25 }
 0x29e   :  { %v890_v28 = vpop.eup %889 }
 0x29f   :  { %v723_v29 = vmul.f32 %v890_v28, %v691_v12  ;;  %v706_v30 = vrot.slane %v705_v26, 2  ;;  %v713_v31 = vrot.slane %v712_v27, 4 }
 0x2a1   :  { %v727_v32 = vsub.f32 2.0, %v723_v29  ;;  %v707_v33 = vadd.f32 %v706_v30, %v705_v26  ;;  %v714_v34 = vadd.f32 %v713_v31, %v712_v27 }
 0x2a3   :  { %v731_v35 = vmul.f32 %v890_v28, %v727_v32  ;;  %v708_v36 = vrot.slane %v707_v33, 1  ;;  %v715_v37 = vrot.slane %v714_v34, 2 }
 0x2a5   :  { %v892_v38 = vpop.eup %891  ;;  %v735_v39 = vmul.f32 %v1077_v41, %v731_v35  ;;  %v736_v8 = vmul.f32 %v1079_v42, %v731_v35  ;;  %v709_v40 = vadd.f32 %v708_v36, %v707_v33  ;;  %v716_v43 = vadd.f32 %v715_v37, %v714_v34 }
 0x2a6   :  { %v724_v44 = vmul.f32 %v892_v38, %v700_v18 }
 0x2a7   :  { %v743_v45 = vmul.f32 %v735_v39, %v1049_v49  ;;  %v744_v46 = vmul.f32 %v736_v8, %v1044_v24  ;;  %893 = vrcp.f32 %v709_v40  ;;  %v717_v47 = vrot.slane %v716_v43, 1 }
 0x2a8   :  { %v728_v48 = vsub.f32 2.0, %v724_v44 }
 0x2a9   :  { %751 = vst.msk [vmem:[%s1147_s6] sm:$0xff] %vm622_vm10, %v743_v45  ;;  %752 = vst.msk [vmem:[%s1147_s6 + $0x8] sm:$0xff] %vm622_vm10, %v744_v46  ;;  %v718_v41 = vadd.f32 %v717_v47, %v716_v43 }
 0x2aa   :  { %v732_v42 = vmul.f32 %v892_v38, %v728_v48 }
 0x2ab   :  { %895 = vrcp.f32 %v718_v41 }
 0x2ac   :  { %v737_v50 = vmul.f32 %v1085_v55, %v732_v42  ;;  %v738_v51 = vmul.f32 %v1087_v60, %v732_v42 }
 0x2ae   :  { %v745_v52 = vmul.f32 %v737_v50, %v1049_v49  ;;  %v746_v53 = vmul.f32 %v738_v51, %v1044_v24 }
 0x2b0   :  { %753 = vst.msk [vmem:[%s1147_s6 + $0x10] sm:$0xff] %vm622_vm10, %v745_v52  ;;  %754 = vst.msk [vmem:[%s1147_s6 + $0x18] sm:$0xff] %vm622_vm10, %v746_v53 }
 0x2b1   :  { %v894_v54 = vpop.eup %893 }
 0x2b2   :  { %v725_v56 = vmul.f32 %v894_v54, %v709_v40 }
 0x2b4   :  { %v729_v57 = vsub.f32 2.0, %v725_v56 }
 0x2b5   :  { %v896_v55 = vpop.eup %895 }
 0x2b6   :  { %v733_v58 = vmul.f32 %v894_v54, %v729_v57  ;;  %v726_v59 = vmul.f32 %v896_v55, %v718_v41 }
 0x2b8   :  { %v739_v60 = vmul.f32 %v882_v14, %v733_v58  ;;  %v740_v61 = vmul.f32 %v884_v15, %v733_v58  ;;  %v730_v62 = vsub.f32 2.0, %v726_v59 }
 0x2ba   :  { %v747_v63 = vmul.f32 %v739_v60, %v1049_v49  ;;  %v748_v1 = vmul.f32 %v740_v61, %v1044_v24  ;;  %v734_v2 = vmul.f32 %v896_v55, %v730_v62 }
 0x2bc   :  { %755 = vst.msk [vmem:[%s1147_s6 + $0x20] sm:$0xff] %vm622_vm10, %v747_v63  ;;  %756 = vst.msk [vmem:[%s1147_s6 + $0x28] sm:$0xff] %vm622_vm10, %v748_v1  ;;  %v741_v3 = vmul.f32 %v886_v20, %v734_v2  ;;  %v742_v5 = vmul.f32 %v888_v21, %v734_v2 }
 0x2be   :  { %v749_v6 = vmul.f32 %v741_v3, %v1049_v49  ;;  %v750_v7 = vmul.f32 %v742_v5, %v1044_v24 }
 0x2c0   :  { %757 = vst.msk [vmem:[%s1147_s6 + $0x30] sm:$0xff] %vm622_vm10, %v749_v6  ;;  %758 = vst.msk [vmem:[%s1147_s6 + $0x38] sm:$0xff] %vm622_vm10, %v750_v7 }

</bundles_post_ra>
